<compile_context>
chip_gen: v5e
topology: v5e:2x2
jax: 0.10.0
libtpu: 0.0.40
codegen_flags: <defaults>
</compile_context>

<pallas_src>
import jax
import jax.numpy as jnp
from jax.experimental import pallas as pl
from jax.experimental.pallas import tpu as pltpu

# ---- small synthetic Plamo2Config -------------------------------------------
HIDDEN = 32           # config.hidden_size
NUM_HEADS = 4         # config.num_attention_heads (tp_size = 1)
NUM_KV_HEADS = 2      # config.num_key_value_heads
HEAD_DIM = 8          # config.hidden_size_per_head
T = 8                 # number of tokens (seq len, causal prefill)
ROPE_THETA = 10000.0
RMS_EPS = 1e-6

Q_SIZE = NUM_HEADS * HEAD_DIM            # 32
KV_SIZE = NUM_KV_HEADS * HEAD_DIM        # 16
QKV_SIZE = Q_SIZE + 2 * KV_SIZE          # 64
SCALING = HEAD_DIM ** -0.5
HALF = HEAD_DIM // 2
HEADS_PER_KV = NUM_HEADS // NUM_KV_HEADS


# ------------------------------- kernel --------------------------------------
def attention_mixer_kernel(h_ref, w_in_ref, wo_ref,
                           mq_ref, eq_ref, pq_ref,
                           mk_ref, ek_ref, pk_ref,
                           cq_ref, sq_ref, ck_ref, sk_ref,
                           o_ref):
    # ---- fused QKV projection: ONE flat lane-dense GEMM -----------------
    h = h_ref[...].astype(jnp.bfloat16)                         # (T, HIDDEN)
    qkv = jnp.dot(h, w_in_ref[...],
                  preferred_element_type=jnp.float32)           # (T, 64) f32

    q = qkv[:, :Q_SIZE]                                         # (T, 32)
    k = qkv[:, Q_SIZE:Q_SIZE + KV_SIZE]                         # (T, 16)
    v = qkv[:, Q_SIZE + KV_SIZE:]                               # (T, 16)

    # ---- per-head RMSNorm on the flat layout (matmul reduce / expand) ----
    #   meansq(T,nh) = (x*x) @ m     (m carries 1/HEAD_DIM)
    #   xn = x * (rsqrt(meansq+eps) @ e)   (e carries rms weight [+ scaling])
    def rms(x, m_ref, e_ref):
        ms = jnp.dot(x * x, m_ref[...], preferred_element_type=jnp.float32)
        r = jax.lax.rsqrt(ms + RMS_EPS)
        return x * jnp.dot(r, e_ref[...], preferred_element_type=jnp.float32)

    qn = rms(q, mq_ref, eq_ref)                                 # scaling folded
    kn = rms(k, mk_ref, ek_ref)

    # ---- neox RoPE on the flat layout: x*cos + (x @ halfswap_perm)*sin ---
    # (sign of sin folded into the table; all f32, exact permutation matmul)
    def rope(x, p_ref, cos, sin):
        shuf = jnp.dot(x, p_ref[...], preferred_element_type=jnp.float32)
        return x * cos + shuf * sin

    q_rot = rope(qn, pq_ref, cq_ref[...], sq_ref[...])          # (T, 32) f32
    k_rot = rope(kn, pk_ref, ck_ref[...], sk_ref[...])          # (T, 16) f32

    # ---- causal attention (full-depth score contraction, GQA via slices) -
    row = jax.lax.broadcasted_iota(jnp.int32, (T, T), 0)
    col = jax.lax.broadcasted_iota(jnp.int32, (T, T), 1)
    causal = row >= col

    heads = []
    for hh in range(NUM_HEADS):
        g = hh // HEADS_PER_KV
        q_h = q_rot[:, hh * HEAD_DIM:(hh + 1) * HEAD_DIM].astype(jnp.bfloat16)
        k_h = k_rot[:, g * HEAD_DIM:(g + 1) * HEAD_DIM].astype(jnp.bfloat16)
        v_h = v[:, g * HEAD_DIM:(g + 1) * HEAD_DIM].astype(jnp.bfloat16)

        s = jnp.einsum('td,sd->ts', q_h, k_h,
                       preferred_element_type=jnp.float32)      # (T, T) f32
        # finite mask value is safe because scores stay f32
        s = jnp.where(causal, s, jnp.float32(-1e30))
        p = jnp.exp(s - jnp.max(s, axis=-1, keepdims=True))
        p = p * pl.reciprocal(jnp.sum(p, axis=-1, keepdims=True), approx=True)
        heads.append(jnp.dot(p.astype(jnp.bfloat16), v_h,
                             preferred_element_type=jnp.float32))

    # lane-dense attention slab (T, H*D)
    attn = jnp.concatenate(heads, axis=-1).astype(jnp.bfloat16)

    # ---- o_proj: ONE flat GEMM, head reduction folded into MXU -----------
    out = jnp.dot(attn, wo_ref[...], preferred_element_type=jnp.float32)
    o_ref[...] = out.astype(o_ref.dtype)


# ----------------------------- wrapper (glue) ---------------------------------
def _head_matrices(n_heads, norm_weight, scale):
    """Tiny matrices that let RMSNorm / RoPE run on the flat (T, n*D) layout."""
    size = n_heads * HEAD_DIM
    col = jnp.arange(size)
    head = col // HEAD_DIM
    pos = col % HEAD_DIM
    onehot = (head[:, None] == jnp.arange(n_heads)[None, :]).astype(jnp.float32)
    # per-head mean-of-squares reducer (1/HEAD_DIM folded in):  (size, n_heads)
    m = onehot / HEAD_DIM
    # rstd expand back to columns, carrying rms weight (+ attn scaling for q)
    e = onehot.T * norm_weight.reshape(-1)[None, :] * scale      # (n_heads, size)
    # within-head half-swap permutation: (x @ p)[:, c] = x[:, src(c)]
    src = head * HEAD_DIM + (pos + HALF) % HEAD_DIM
    p = (col[:, None] == src[None, :]).astype(jnp.float32)       # (size, size)
    return m, e, p


def _build_kernel_weights(params):
    """Layout plumbing done once in XLA: flat pre-transposed GEMM weights."""
    w_in = params["w_qkv"].T.astype(jnp.bfloat16)                # (HIDDEN, 64)
    wo = params["w_o"].T.astype(jnp.bfloat16)                    # (Q_SIZE, HIDDEN)
    mq, eq, pq = _head_matrices(NUM_HEADS, params["q_weight"], SCALING)
    mk, ek, pk = _head_matrices(NUM_KV_HEADS, params["k_weight"], 1.0)
    return w_in, wo, mq, eq, pq, mk, ek, pk


def plamo2_attention_mixer(positions, hidden_states, params):
    # neox rope tables (rotary_dim = HEAD_DIM), laid out per flat head column
    inv_freq = 1.0 / (ROPE_THETA ** (
        jnp.arange(0, HEAD_DIM, 2, dtype=jnp.float32) / HEAD_DIM))
    freqs = positions.astype(jnp.float32)[:, None] * inv_freq[None, :]  # (T, HALF)
    cos_d = jnp.concatenate([jnp.cos(freqs), jnp.cos(freqs)], axis=-1)  # (T, D)
    sin_d = jnp.concatenate([-jnp.sin(freqs), jnp.sin(freqs)], axis=-1) # sign folded
    cq = jnp.tile(cos_d, (1, NUM_HEADS))                                # (T, Q_SIZE)
    sq = jnp.tile(sin_d, (1, NUM_HEADS))
    ck = jnp.tile(cos_d, (1, NUM_KV_HEADS))                             # (T, KV_SIZE)
    sk = jnp.tile(sin_d, (1, NUM_KV_HEADS))

    w_in, wo, mq, eq, pq, mk, ek, pk = _build_kernel_weights(params)

    vmem = pl.BlockSpec(memory_space=pltpu.MemorySpace.VMEM)
    return pl.pallas_call(
        attention_mixer_kernel,
        out_shape=jax.ShapeDtypeStruct((T, HIDDEN), hidden_states.dtype),
        in_specs=[vmem] * 13,
        out_specs=vmem,
    )(hidden_states, w_in, wo, mq, eq, pq, mk, ek, pk, cq, sq, ck, sk)


# --------------------------- pure-JAX reference ------------------------------
def _reference(positions, hidden_states, params):
    inv_freq = 1.0 / (ROPE_THETA ** (
        jnp.arange(0, HEAD_DIM, 2, dtype=jnp.float32) / HEAD_DIM))
    freqs = positions.astype(jnp.float32)[:, None] * inv_freq[None, :]
    cos, sin = jnp.cos(freqs), jnp.sin(freqs)

    def rms(x, w):  # x: (T, n, d), w: (n, d)
        var = jnp.mean(x.astype(jnp.float32) ** 2, axis=-1, keepdims=True)
        return (x * jax.lax.rsqrt(var + RMS_EPS)) * w[None]

    def rope(x):  # (T, n, d)
        x1, x2 = x[..., :HALF], x[..., HALF:]
        c, s = cos[:, None, :], sin[:, None, :]
        return jnp.concatenate([x1 * c - x2 * s, x2 * c + x1 * s], axis=-1)

    qkv = hidden_states @ params["w_qkv"].T
    q = rope(rms(qkv[:, :Q_SIZE].reshape(T, NUM_HEADS, HEAD_DIM),
                 params["q_weight"]))
    k = rope(rms(qkv[:, Q_SIZE:Q_SIZE + KV_SIZE].reshape(T, NUM_KV_HEADS,
                                                         HEAD_DIM),
                 params["k_weight"]))
    v = qkv[:, Q_SIZE + KV_SIZE:].reshape(T, NUM_KV_HEADS, HEAD_DIM)
    k = jnp.repeat(k, HEADS_PER_KV, axis=1)
    v = jnp.repeat(v, HEADS_PER_KV, axis=1)
    scores = jnp.einsum("qhd,khd->hqk", q, k) * SCALING
    mask = jnp.tril(jnp.ones((T, T), bool))
    scores = jnp.where(mask[None], scores, -jnp.inf)
    p = jax.nn.softmax(scores, axis=-1)
    attn = jnp.einsum("hqk,khd->qhd", p, v).reshape(T, Q_SIZE)
    return attn @ params["w_o"].T


if __name__ == "__main__":
    key = jax.random.PRNGKey(0)
    k1, k2, k3, k4, k5 = jax.random.split(key, 5)

    params = {
        # nn.Linear layout: (out_features, in_features), no bias
        "w_qkv": jax.random.normal(k1, (QKV_SIZE, HIDDEN), jnp.float32) * 0.05,
        "w_o": jax.random.normal(k2, (HIDDEN, Q_SIZE), jnp.float32) * 0.05,
        # module init is ones; perturb slightly so the norm-weight path is exercised
        "q_weight": 1.0 + 0.1 * jax.random.normal(
            k4, (NUM_HEADS, HEAD_DIM), jnp.float32),
        "k_weight": 1.0 + 0.1 * jax.random.normal(
            k5, (NUM_KV_HEADS, HEAD_DIM), jnp.float32),
    }

    hidden_states = jax.random.normal(k3, (T, HIDDEN), jnp.float32)
    positions = jnp.arange(T, dtype=jnp.int32)

    out = plamo2_attention_mixer(positions, hidden_states, params)
    out = jax.block_until_ready(out)

    ref = _reference(positions, hidden_states, params)
    assert out.shape == (T, HIDDEN)
    # bf16 MXU inputs (f32 accumulation) -> relaxed tolerance vs f32 reference
    assert jnp.allclose(out, ref, rtol=3e-2, atol=5e-3), "mismatch vs reference"

    print("KERNEL_OK")
</pallas_src>

<mosaic_0001>
module attributes {stable_mosaic.version = 11 : i64} {
  func.func @attention_mixer_kernel(%arg0: memref<8x32xf32, #tpu.memory_space<vmem>>, %arg1: memref<32x64xbf16, #tpu.memory_space<vmem>>, %arg2: memref<32x32xbf16, #tpu.memory_space<vmem>>, %arg3: memref<32x4xf32, #tpu.memory_space<vmem>>, %arg4: memref<4x32xf32, #tpu.memory_space<vmem>>, %arg5: memref<32x32xf32, #tpu.memory_space<vmem>>, %arg6: memref<16x2xf32, #tpu.memory_space<vmem>>, %arg7: memref<2x16xf32, #tpu.memory_space<vmem>>, %arg8: memref<16x16xf32, #tpu.memory_space<vmem>>, %arg9: memref<8x32xf32, #tpu.memory_space<vmem>>, %arg10: memref<8x32xf32, #tpu.memory_space<vmem>>, %arg11: memref<8x16xf32, #tpu.memory_space<vmem>>, %arg12: memref<8x16xf32, #tpu.memory_space<vmem>>, %arg13: memref<8x32xf32, #tpu.memory_space<vmem>>) attributes {dimension_semantics = [], scalar_prefetch = 0 : i64, scratch_operands = 0 : i64, tpu.core_type = #tpu.core_type<tc>} {
    %c0 = arith.constant 0 : index
    %c0_0 = arith.constant 0 : index
    %0 = vector.load %arg0[%c0, %c0_0] : memref<8x32xf32, #tpu.memory_space<vmem>>, vector<8x32xf32>
    %1 = arith.truncf %0 : vector<8x32xf32> to vector<8x32xbf16>
    %c0_1 = arith.constant 0 : index
    %c0_2 = arith.constant 0 : index
    %2 = vector.load %arg1[%c0_1, %c0_2] : memref<32x64xbf16, #tpu.memory_space<vmem>>, vector<32x64xbf16>
    %cst = arith.constant dense<0.000000e+00> : vector<8x64xf32>
    %3 = tpu.matmul %1, %2, %cst {dimension_numbers = #tpu.dot_dimension_numbers<[1], [0], [0], [1], [0, 0, 1, 1], [], []>} : vector<8x32xbf16>, vector<32x64xbf16>, vector<8x64xf32> -> vector<8x64xf32>
    %4 = vector.extract_strided_slice %3 {offsets = [0, 0], sizes = [8, 32], strides = [1, 1]} : vector<8x64xf32> to vector<8x32xf32>
    %5 = vector.extract_strided_slice %3 {offsets = [0, 32], sizes = [8, 16], strides = [1, 1]} : vector<8x64xf32> to vector<8x16xf32>
    %6 = vector.extract_strided_slice %3 {offsets = [0, 48], sizes = [8, 16], strides = [1, 1]} : vector<8x64xf32> to vector<8x16xf32>
    %7 = arith.mulf %4, %4 : vector<8x32xf32>
    %c0_3 = arith.constant 0 : index
    %c0_4 = arith.constant 0 : index
    %8 = vector.load %arg3[%c0_3, %c0_4] : memref<32x4xf32, #tpu.memory_space<vmem>>, vector<32x4xf32>
    %cst_5 = arith.constant dense<0.000000e+00> : vector<8x4xf32>
    %9 = tpu.matmul %7, %8, %cst_5 {dimension_numbers = #tpu.dot_dimension_numbers<[1], [0], [0], [1], [0, 0, 1, 1], [], []>} : vector<8x32xf32>, vector<32x4xf32>, vector<8x4xf32> -> vector<8x4xf32>
    %cst_6 = arith.constant 9.99999997E-7 : f32
    %10 = vector.broadcast %cst_6 : f32 to vector<8x4xf32>
    %11 = arith.addf %9, %10 : vector<8x4xf32>
    %12 = math.rsqrt %11 : vector<8x4xf32>
    %c0_7 = arith.constant 0 : index
    %c0_8 = arith.constant 0 : index
    %13 = vector.load %arg4[%c0_7, %c0_8] : memref<4x32xf32, #tpu.memory_space<vmem>>, vector<4x32xf32>
    %cst_9 = arith.constant dense<0.000000e+00> : vector<8x32xf32>
    %14 = tpu.matmul %12, %13, %cst_9 {dimension_numbers = #tpu.dot_dimension_numbers<[1], [0], [0], [1], [0, 0, 1, 1], [], []>} : vector<8x4xf32>, vector<4x32xf32>, vector<8x32xf32> -> vector<8x32xf32>
    %15 = arith.mulf %4, %14 : vector<8x32xf32>
    %16 = arith.mulf %5, %5 : vector<8x16xf32>
    %c0_10 = arith.constant 0 : index
    %c0_11 = arith.constant 0 : index
    %17 = vector.load %arg6[%c0_10, %c0_11] : memref<16x2xf32, #tpu.memory_space<vmem>>, vector<16x2xf32>
    %cst_12 = arith.constant dense<0.000000e+00> : vector<8x2xf32>
    %18 = tpu.matmul %16, %17, %cst_12 {dimension_numbers = #tpu.dot_dimension_numbers<[1], [0], [0], [1], [0, 0, 1, 1], [], []>} : vector<8x16xf32>, vector<16x2xf32>, vector<8x2xf32> -> vector<8x2xf32>
    %cst_13 = arith.constant 9.99999997E-7 : f32
    %19 = vector.broadcast %cst_13 : f32 to vector<8x2xf32>
    %20 = arith.addf %18, %19 : vector<8x2xf32>
    %21 = math.rsqrt %20 : vector<8x2xf32>
    %c0_14 = arith.constant 0 : index
    %c0_15 = arith.constant 0 : index
    %22 = vector.load %arg7[%c0_14, %c0_15] : memref<2x16xf32, #tpu.memory_space<vmem>>, vector<2x16xf32>
    %cst_16 = arith.constant dense<0.000000e+00> : vector<8x16xf32>
    %23 = tpu.matmul %21, %22, %cst_16 {dimension_numbers = #tpu.dot_dimension_numbers<[1], [0], [0], [1], [0, 0, 1, 1], [], []>} : vector<8x2xf32>, vector<2x16xf32>, vector<8x16xf32> -> vector<8x16xf32>
    %24 = arith.mulf %5, %23 : vector<8x16xf32>
    %c0_17 = arith.constant 0 : index
    %c0_18 = arith.constant 0 : index
    %25 = vector.load %arg9[%c0_17, %c0_18] : memref<8x32xf32, #tpu.memory_space<vmem>>, vector<8x32xf32>
    %c0_19 = arith.constant 0 : index
    %c0_20 = arith.constant 0 : index
    %26 = vector.load %arg10[%c0_19, %c0_20] : memref<8x32xf32, #tpu.memory_space<vmem>>, vector<8x32xf32>
    %c0_21 = arith.constant 0 : index
    %c0_22 = arith.constant 0 : index
    %27 = vector.load %arg5[%c0_21, %c0_22] : memref<32x32xf32, #tpu.memory_space<vmem>>, vector<32x32xf32>
    %cst_23 = arith.constant dense<0.000000e+00> : vector<8x32xf32>
    %28 = tpu.matmul %15, %27, %cst_23 {dimension_numbers = #tpu.dot_dimension_numbers<[1], [0], [0], [1], [0, 0, 1, 1], [], []>} : vector<8x32xf32>, vector<32x32xf32>, vector<8x32xf32> -> vector<8x32xf32>
    %29 = arith.mulf %15, %25 : vector<8x32xf32>
    %30 = arith.mulf %28, %26 : vector<8x32xf32>
    %31 = arith.addf %29, %30 : vector<8x32xf32>
    %c0_24 = arith.constant 0 : index
    %c0_25 = arith.constant 0 : index
    %32 = vector.load %arg11[%c0_24, %c0_25] : memref<8x16xf32, #tpu.memory_space<vmem>>, vector<8x16xf32>
    %c0_26 = arith.constant 0 : index
    %c0_27 = arith.constant 0 : index
    %33 = vector.load %arg12[%c0_26, %c0_27] : memref<8x16xf32, #tpu.memory_space<vmem>>, vector<8x16xf32>
    %c0_28 = arith.constant 0 : index
    %c0_29 = arith.constant 0 : index
    %34 = vector.load %arg8[%c0_28, %c0_29] : memref<16x16xf32, #tpu.memory_space<vmem>>, vector<16x16xf32>
    %cst_30 = arith.constant dense<0.000000e+00> : vector<8x16xf32>
    %35 = tpu.matmul %24, %34, %cst_30 {dimension_numbers = #tpu.dot_dimension_numbers<[1], [0], [0], [1], [0, 0, 1, 1], [], []>} : vector<8x16xf32>, vector<16x16xf32>, vector<8x16xf32> -> vector<8x16xf32>
    %36 = arith.mulf %24, %32 : vector<8x16xf32>
    %37 = arith.mulf %35, %33 : vector<8x16xf32>
    %38 = arith.addf %36, %37 : vector<8x16xf32>
    %39 = tpu.iota {dimensions = array<i32: 0>} : vector<8x8xi32>
    %40 = tpu.iota {dimensions = array<i32: 1>} : vector<8x8xi32>
    %41 = arith.cmpi sge, %39, %40 : vector<8x8xi32>
    %42 = vector.extract_strided_slice %31 {offsets = [0, 0], sizes = [8, 8], strides = [1, 1]} : vector<8x32xf32> to vector<8x8xf32>
    %43 = arith.truncf %42 : vector<8x8xf32> to vector<8x8xbf16>
    %44 = vector.extract_strided_slice %38 {offsets = [0, 0], sizes = [8, 8], strides = [1, 1]} : vector<8x16xf32> to vector<8x8xf32>
    %45 = arith.truncf %44 : vector<8x8xf32> to vector<8x8xbf16>
    %46 = vector.extract_strided_slice %6 {offsets = [0, 0], sizes = [8, 8], strides = [1, 1]} : vector<8x16xf32> to vector<8x8xf32>
    %47 = arith.truncf %46 : vector<8x8xf32> to vector<8x8xbf16>
    "tpu.trace_start"() <{level = 10 : i32, message = "td,sd->ts"}> : () -> ()
    %cst_31 = arith.constant dense<0.000000e+00> : vector<8x8xf32>
    %48 = tpu.matmul %43, %45, %cst_31 {dimension_numbers = #tpu.dot_dimension_numbers<[1], [1], [0], [0], [0, 0, 1, 0], [], []>} : vector<8x8xbf16>, vector<8x8xbf16>, vector<8x8xf32> -> vector<8x8xf32>
    %cst_32 = arith.constant -1.000000e+30 : f32
    "tpu.trace_stop"() : () -> ()
    %49 = vector.broadcast %cst_32 : f32 to vector<8x8xf32>
    %50 = arith.select %41, %48, %49 : vector<8x8xi1>, vector<8x8xf32>
    %cst_33 = arith.constant dense<0xFF800000> : vector<8xf32>
    %51 = vector.multi_reduction <maximumf>, %50, %cst_33 [1] : vector<8x8xf32> to vector<8xf32>
    %52 = vector.shape_cast %51 : vector<8xf32> to vector<8x1xf32>
    %53 = vector.broadcast %52 : vector<8x1xf32> to vector<8x8xf32>
    %54 = arith.subf %50, %53 : vector<8x8xf32>
    %55 = math.exp %54 : vector<8x8xf32>
    %cst_34 = arith.constant dense<0.000000e+00> : vector<8xf32>
    %56 = vector.multi_reduction <add>, %55, %cst_34 [1] : vector<8x8xf32> to vector<8xf32>
    %57 = vector.shape_cast %56 : vector<8xf32> to vector<8x1xf32>
    %58 = tpu.reciprocal %57 {approx = true} : vector<8x1xf32> -> vector<8x1xf32>
    %59 = vector.broadcast %58 : vector<8x1xf32> to vector<8x8xf32>
    %60 = arith.mulf %55, %59 : vector<8x8xf32>
    %61 = arith.truncf %60 : vector<8x8xf32> to vector<8x8xbf16>
    %cst_35 = arith.constant dense<0.000000e+00> : vector<8x8xf32>
    %62 = tpu.matmul %61, %47, %cst_35 {dimension_numbers = #tpu.dot_dimension_numbers<[1], [0], [0], [1], [0, 0, 1, 1], [], []>} : vector<8x8xbf16>, vector<8x8xbf16>, vector<8x8xf32> -> vector<8x8xf32>
    %63 = vector.extract_strided_slice %31 {offsets = [0, 8], sizes = [8, 8], strides = [1, 1]} : vector<8x32xf32> to vector<8x8xf32>
    %64 = arith.truncf %63 : vector<8x8xf32> to vector<8x8xbf16>
    %65 = vector.extract_strided_slice %38 {offsets = [0, 0], sizes = [8, 8], strides = [1, 1]} : vector<8x16xf32> to vector<8x8xf32>
    %66 = arith.truncf %65 : vector<8x8xf32> to vector<8x8xbf16>
    %67 = vector.extract_strided_slice %6 {offsets = [0, 0], sizes = [8, 8], strides = [1, 1]} : vector<8x16xf32> to vector<8x8xf32>
    %68 = arith.truncf %67 : vector<8x8xf32> to vector<8x8xbf16>
    "tpu.trace_start"() <{level = 10 : i32, message = "td,sd->ts"}> : () -> ()
    %cst_36 = arith.constant dense<0.000000e+00> : vector<8x8xf32>
    %69 = tpu.matmul %64, %66, %cst_36 {dimension_numbers = #tpu.dot_dimension_numbers<[1], [1], [0], [0], [0, 0, 1, 0], [], []>} : vector<8x8xbf16>, vector<8x8xbf16>, vector<8x8xf32> -> vector<8x8xf32>
    %cst_37 = arith.constant -1.000000e+30 : f32
    "tpu.trace_stop"() : () -> ()
    %70 = vector.broadcast %cst_37 : f32 to vector<8x8xf32>
    %71 = arith.select %41, %69, %70 : vector<8x8xi1>, vector<8x8xf32>
    %cst_38 = arith.constant dense<0xFF800000> : vector<8xf32>
    %72 = vector.multi_reduction <maximumf>, %71, %cst_38 [1] : vector<8x8xf32> to vector<8xf32>
    %73 = vector.shape_cast %72 : vector<8xf32> to vector<8x1xf32>
    %74 = vector.broadcast %73 : vector<8x1xf32> to vector<8x8xf32>
    %75 = arith.subf %71, %74 : vector<8x8xf32>
    %76 = math.exp %75 : vector<8x8xf32>
    %cst_39 = arith.constant dense<0.000000e+00> : vector<8xf32>
    %77 = vector.multi_reduction <add>, %76, %cst_39 [1] : vector<8x8xf32> to vector<8xf32>
    %78 = vector.shape_cast %77 : vector<8xf32> to vector<8x1xf32>
    %79 = tpu.reciprocal %78 {approx = true} : vector<8x1xf32> -> vector<8x1xf32>
    %80 = vector.broadcast %79 : vector<8x1xf32> to vector<8x8xf32>
    %81 = arith.mulf %76, %80 : vector<8x8xf32>
    %82 = arith.truncf %81 : vector<8x8xf32> to vector<8x8xbf16>
    %cst_40 = arith.constant dense<0.000000e+00> : vector<8x8xf32>
    %83 = tpu.matmul %82, %68, %cst_40 {dimension_numbers = #tpu.dot_dimension_numbers<[1], [0], [0], [1], [0, 0, 1, 1], [], []>} : vector<8x8xbf16>, vector<8x8xbf16>, vector<8x8xf32> -> vector<8x8xf32>
    %84 = vector.extract_strided_slice %31 {offsets = [0, 16], sizes = [8, 8], strides = [1, 1]} : vector<8x32xf32> to vector<8x8xf32>
    %85 = arith.truncf %84 : vector<8x8xf32> to vector<8x8xbf16>
    %86 = vector.extract_strided_slice %38 {offsets = [0, 8], sizes = [8, 8], strides = [1, 1]} : vector<8x16xf32> to vector<8x8xf32>
    %87 = arith.truncf %86 : vector<8x8xf32> to vector<8x8xbf16>
    %88 = vector.extract_strided_slice %6 {offsets = [0, 8], sizes = [8, 8], strides = [1, 1]} : vector<8x16xf32> to vector<8x8xf32>
    %89 = arith.truncf %88 : vector<8x8xf32> to vector<8x8xbf16>
    "tpu.trace_start"() <{level = 10 : i32, message = "td,sd->ts"}> : () -> ()
    %cst_41 = arith.constant dense<0.000000e+00> : vector<8x8xf32>
    %90 = tpu.matmul %85, %87, %cst_41 {dimension_numbers = #tpu.dot_dimension_numbers<[1], [1], [0], [0], [0, 0, 1, 0], [], []>} : vector<8x8xbf16>, vector<8x8xbf16>, vector<8x8xf32> -> vector<8x8xf32>
    %cst_42 = arith.constant -1.000000e+30 : f32
    "tpu.trace_stop"() : () -> ()
    %91 = vector.broadcast %cst_42 : f32 to vector<8x8xf32>
    %92 = arith.select %41, %90, %91 : vector<8x8xi1>, vector<8x8xf32>
    %cst_43 = arith.constant dense<0xFF800000> : vector<8xf32>
    %93 = vector.multi_reduction <maximumf>, %92, %cst_43 [1] : vector<8x8xf32> to vector<8xf32>
    %94 = vector.shape_cast %93 : vector<8xf32> to vector<8x1xf32>
    %95 = vector.broadcast %94 : vector<8x1xf32> to vector<8x8xf32>
    %96 = arith.subf %92, %95 : vector<8x8xf32>
    %97 = math.exp %96 : vector<8x8xf32>
    %cst_44 = arith.constant dense<0.000000e+00> : vector<8xf32>
    %98 = vector.multi_reduction <add>, %97, %cst_44 [1] : vector<8x8xf32> to vector<8xf32>
    %99 = vector.shape_cast %98 : vector<8xf32> to vector<8x1xf32>
    %100 = tpu.reciprocal %99 {approx = true} : vector<8x1xf32> -> vector<8x1xf32>
    %101 = vector.broadcast %100 : vector<8x1xf32> to vector<8x8xf32>
    %102 = arith.mulf %97, %101 : vector<8x8xf32>
    %103 = arith.truncf %102 : vector<8x8xf32> to vector<8x8xbf16>
    %cst_45 = arith.constant dense<0.000000e+00> : vector<8x8xf32>
    %104 = tpu.matmul %103, %89, %cst_45 {dimension_numbers = #tpu.dot_dimension_numbers<[1], [0], [0], [1], [0, 0, 1, 1], [], []>} : vector<8x8xbf16>, vector<8x8xbf16>, vector<8x8xf32> -> vector<8x8xf32>
    %105 = vector.extract_strided_slice %31 {offsets = [0, 24], sizes = [8, 8], strides = [1, 1]} : vector<8x32xf32> to vector<8x8xf32>
    %106 = arith.truncf %105 : vector<8x8xf32> to vector<8x8xbf16>
    %107 = vector.extract_strided_slice %38 {offsets = [0, 8], sizes = [8, 8], strides = [1, 1]} : vector<8x16xf32> to vector<8x8xf32>
    %108 = arith.truncf %107 : vector<8x8xf32> to vector<8x8xbf16>
    %109 = vector.extract_strided_slice %6 {offsets = [0, 8], sizes = [8, 8], strides = [1, 1]} : vector<8x16xf32> to vector<8x8xf32>
    %110 = arith.truncf %109 : vector<8x8xf32> to vector<8x8xbf16>
    "tpu.trace_start"() <{level = 10 : i32, message = "td,sd->ts"}> : () -> ()
    %cst_46 = arith.constant dense<0.000000e+00> : vector<8x8xf32>
    %111 = tpu.matmul %106, %108, %cst_46 {dimension_numbers = #tpu.dot_dimension_numbers<[1], [1], [0], [0], [0, 0, 1, 0], [], []>} : vector<8x8xbf16>, vector<8x8xbf16>, vector<8x8xf32> -> vector<8x8xf32>
    %cst_47 = arith.constant -1.000000e+30 : f32
    "tpu.trace_stop"() : () -> ()
    %112 = vector.broadcast %cst_47 : f32 to vector<8x8xf32>
    %113 = arith.select %41, %111, %112 : vector<8x8xi1>, vector<8x8xf32>
    %cst_48 = arith.constant dense<0xFF800000> : vector<8xf32>
    %114 = vector.multi_reduction <maximumf>, %113, %cst_48 [1] : vector<8x8xf32> to vector<8xf32>
    %115 = vector.shape_cast %114 : vector<8xf32> to vector<8x1xf32>
    %116 = vector.broadcast %115 : vector<8x1xf32> to vector<8x8xf32>
    %117 = arith.subf %113, %116 : vector<8x8xf32>
    %118 = math.exp %117 : vector<8x8xf32>
    %cst_49 = arith.constant dense<0.000000e+00> : vector<8xf32>
    %119 = vector.multi_reduction <add>, %118, %cst_49 [1] : vector<8x8xf32> to vector<8xf32>
    %120 = vector.shape_cast %119 : vector<8xf32> to vector<8x1xf32>
    %121 = tpu.reciprocal %120 {approx = true} : vector<8x1xf32> -> vector<8x1xf32>
    %122 = vector.broadcast %121 : vector<8x1xf32> to vector<8x8xf32>
    %123 = arith.mulf %118, %122 : vector<8x8xf32>
    %124 = arith.truncf %123 : vector<8x8xf32> to vector<8x8xbf16>
    %cst_50 = arith.constant dense<0.000000e+00> : vector<8x8xf32>
    %125 = tpu.matmul %124, %110, %cst_50 {dimension_numbers = #tpu.dot_dimension_numbers<[1], [0], [0], [1], [0, 0, 1, 1], [], []>} : vector<8x8xbf16>, vector<8x8xbf16>, vector<8x8xf32> -> vector<8x8xf32>
    %126 = tpu.concatenate %62, %83, %104, %125 in 1 : vector<8x8xf32>, vector<8x8xf32>, vector<8x8xf32>, vector<8x8xf32> -> vector<8x32xf32>
    %127 = arith.truncf %126 : vector<8x32xf32> to vector<8x32xbf16>
    %c0_51 = arith.constant 0 : index
    %c0_52 = arith.constant 0 : index
    %128 = vector.load %arg2[%c0_51, %c0_52] : memref<32x32xbf16, #tpu.memory_space<vmem>>, vector<32x32xbf16>
    %cst_53 = arith.constant dense<0.000000e+00> : vector<8x32xf32>
    %129 = tpu.matmul %127, %128, %cst_53 {dimension_numbers = #tpu.dot_dimension_numbers<[1], [0], [0], [1], [0, 0, 1, 1], [], []>} : vector<8x32xbf16>, vector<32x32xbf16>, vector<8x32xf32> -> vector<8x32xf32>
    %c0_54 = arith.constant 0 : index
    %c0_55 = arith.constant 0 : index
    %130 = vector.load %arg13[%c0_54, %c0_55] : memref<8x32xf32, #tpu.memory_space<vmem>>, vector<8x32xf32>
    tpu.vector_store %arg13[%c0_54, %c0_55], %129 {strides = array<i32>} : memref<8x32xf32, #tpu.memory_space<vmem>>, vector<8x32xf32>,
    return
  }
}

</mosaic_0001>

<bundles_post_ra>
// kernel: tpu_custom_call.1
= control target key start
LH: loop header
LB: loop body
LE: loop exit
PB: predicated region body
PF: predicated region fallthrough
CT: control target
= control target key end

     0   :  { %18 = vsyncpa [#allocation3], 0  ;;  %s1166_s0 = inlined_call_operand.hbm [shape: f32[8,32], index: 0, kind: input, shape index: {}]   ;;  %s1167_s1 = inlined_call_operand.vmem [shape: bf16[32,64], index: 1, kind: input, shape index: {}]   ;;  %s1168_s2 = inlined_call_operand.hbm [shape: bf16[32,32], index: 2, kind: input, shape index: {}]   ;;  %s1169_s3 = inlined_call_operand.vmem [shape: f32[32,4], index: 3, kind: input, shape index: {}]   ;;  %s1170_s4 = inlined_call_operand.hbm [shape: f32[4,32], index: 4, kind: input, shape index: {}]   ;;  %s1171_s5 = inlined_call_operand.vmem [shape: f32[32,32], index: 5, kind: input, shape index: {}]   ;;  %s1172_s6 = inlined_call_operand.vmem [shape: f32[16,2], index: 6, kind: input, shape index: {}]   ;;  %s1173_s7 = inlined_call_operand.vmem [shape: f32[2,16], index: 7, kind: input, shape index: {}]   ;;  %s1174_s8 = inlined_call_operand.hbm [shape: f32[16,16], index: 8, kind: input, shape index: {}]   ;;  %s1175_s9 = inlined_call_operand.hbm [shape: f32[8,32], index: 9, kind: input, shape index: {}]   ;;  %s1176_s10 = inlined_call_operand.hbm [shape: f32[8,32], index: 10, kind: input, shape index: {}]   ;;  %s1177_s11 = inlined_call_operand.vmem [shape: f32[8,16], index: 11, kind: input, shape index: {}]   ;;  %s1178_s12 = inlined_call_operand.hbm [shape: f32[8,16], index: 12, kind: input, shape index: {}]   ;;  %s1179_s13 = inlined_call_operand.hbm [shape: f32[8,32], index: 13, kind: output, shape index: {}]  }
   0x1   :  { %19 = vsyncpa [#allocation6], 0 }
   0x2   :  { %20 = vsyncpa [#allocation9], 0 }
   0x3   :  { %21 = vsyncpa [#allocation12], 0  ;;  %s40_s27 = sshll.u32 %s1168_s2, 4  ;;  %s41_s27 = int_to_ptr.hbm [resolvable:$true] %s40_s27 }
   0x4   :  { %22 = vsyncpa [#allocation4], 0  ;;  %s961_s28 = smov [#allocation5]   ;;  %s72_s15 = sshll.u32 %s1174_s8, 4  ;;  %s73_s15 = int_to_ptr.hbm [resolvable:$true] %s72_s15 }
   0x5   :  { %s42_s29 = sshll.u32 %s961_s28, 4  ;;  %s962_s16 = smov 64   ;;  %s43_s29 = int_to_ptr.vmem [resolvable:$true] %s42_s29 }
   0x6   :  { %s963_s17 = smov 4   ;;  %s964_s18 = smov [#allocation8]  }
   0x7   :  { %48 = dma.hbm_to_vmem [thread:$0]  %s41_s27, 256, %s43_s29, [#allocation6], %s962_s16, %s962_s16, %s963_s17  }
   0x8   :  { %s74_s19 = sshll.u32 %s964_s18, 4  ;;  %s965_s20 = smov 128   ;;  %s75_s19 = int_to_ptr.vmem [resolvable:$true] %s74_s19 }
   0x9   :  { %s966_s21 = smov 8   ;;  %s97_s23 = sshll.u32 %s1176_s10, 4  ;;  %s98_s23 = int_to_ptr.hbm [resolvable:$true] %s97_s23 }
   0xa   :  { %80 = dma.hbm_to_vmem [thread:$0]  %s73_s15, 256, %s75_s19, [#allocation9], %s965_s20, %s965_s20, %s966_s21  }
   0xb   :  { %s967_s24 = smov [#allocation11]   ;;  %s28_s27 = sshll.u32 %s1166_s0, 4  ;;  %s29_s27 = int_to_ptr.hbm [resolvable:$true] %s28_s27 }
   0xc   :  { %s99_s25 = sshll.u32 %s967_s24, 4  ;;  %s968_s28 = smov [#allocation2]   ;;  %s100_s25 = int_to_ptr.vmem [resolvable:$true] %s99_s25 }
   0xd   :  { %102 = dma.hbm_to_vmem [thread:$0]  %s98_s23, 128, %s100_s25, [#allocation12]  }
   0xe   :  { %s30_s29 = sshll.u32 %s968_s28, 4  ;;  %s56_s15 = sshll.u32 %s1170_s4, 4  ;;  %s31_s29 = int_to_ptr.vmem [resolvable:$true] %s30_s29  ;;  %s57_s15 = int_to_ptr.hbm [resolvable:$true] %s56_s15 }
   0xf   :  { %33 = dma.hbm_to_vmem [thread:$0]  %s29_s27, 128, %s31_s29, [#allocation3]  }
  0x10   :  { %s86_s17 = sshll.u32 %s1175_s9, 4  ;;  %s969_s18 = smov [#allocation7]   ;;  %s87_s17 = int_to_ptr.hbm [resolvable:$true] %s86_s17 }
  0x11   :  { %s58_s19 = sshll.u32 %s969_s18, 4  ;;  %s970_s0 = smov [#allocation10]   ;;  %s59_s19 = int_to_ptr.vmem [resolvable:$true] %s58_s19 }
  0x12   :  { %61 = dma.hbm_to_vmem [thread:$0]  %s57_s15, 64, %s59_s19, [#allocation6]  }
  0x13   :  { %s88_s20 = sshll.u32 %s970_s0, 4  ;;  %s110_s23 = sshll.u32 %s1178_s12, 4  ;;  %s89_s20 = int_to_ptr.vmem [resolvable:$true] %s88_s20  ;;  %s111_s23 = int_to_ptr.hbm [resolvable:$true] %s110_s23 }
  0x14   :  { %91 = dma.hbm_to_vmem [thread:$0]  %s87_s17, 128, %s89_s20, [#allocation9]  }
  0x15   :  { %s971_s4 = smov [#allocation13]  }
  0x16   :  { %s112_s24 = sshll.u32 %s971_s4, 4  ;;  %s113_s24 = int_to_ptr.vmem [resolvable:$true] %s112_s24 }
  0x17   :  { %115 = dma.hbm_to_vmem [thread:$0]  %s111_s23, 128, %s113_s24, [#allocation12]  }
  0x18   :  { %951 = dma.done.wait [#allocation3], 128  }
  0x19   :  { %952 = vsyncadd [#allocation3], 4294967168 }
  0x1a   :  { %953 = dma.done.wait [#allocation6], 320  }
  0x1b   :  { %954 = vsyncadd [#allocation6], 4294966976 }
  0x1c   :  { %955 = dma.done.wait [#allocation9], 384  }
  0x1d   :  { %956 = vsyncadd [#allocation9], 4294966912 }
  0x1e   :  { %957 = dma.done.wait [#allocation12], 256  }
  0x1f   :  { %958 = vsyncadd [#allocation12], 4294967040  ;;  %v714_v0 = vld [vmem:[%s1167_s1 + $0x8] sm:$0xff]  ;;  %v184_v1 = vld [vmem:[%s1169_s3 + $0x18] sm:$0xff]  ;;  %vm163_vm0 = vcmask 261120   ;;  %vm223_vm1 = vcmask 1043456  }
  0x20   :  { %v183_v2 = vld [vmem:[%s1169_s3 + $0x10] sm:$0xff]  ;;  %173 = vmatpush.bf16.msra.mxu0 %v714_v0  ;;  %v713_v3 = vld [vmem:[%s1167_s1] sm:$0xff]  ;;  %200 = vmatpush.msra.mxu1 %v184_v1  ;;  %v182_v6 = vld [vmem:[%s1169_s3 + $0x8] sm:$0xff]  ;;  %s972_s1 = smov 96   ;;  %vm219_vm4 = vcmask 31744   ;;  %vm252_vm6 = vcmask 130048  }
  0x21   :  { %v145_v4 = vld [vmem:[#allocation2] sm:$0xff]  ;;  %v218_v11 = vld [vmem:[#allocation7] sm:$0xf]  ;;  %v249_v12 = vld [vmem:[%s1172_s6 + $0x8] sm:$0xff]  ;;  %vm290_vm7 = vcmask 1041408   ;;  %vm286_vm10 = vcmask 15360  }
  0x22   :  { %201 = vmatpush.msra.mxu1 %v183_v2  ;;  %v146_v5 = vpack.c.bf16 %v145_v4, %v145_v4  ;;  %v181_v7 = vld [vmem:[%s1169_s3] sm:$0xff]  ;;  %689 = vmatpush.msk.msra.mxu3 %vm223_vm1, %v218_v11  ;;  %v324_v22 = vld [vmem:[%s1171_s5 + $0x18] sm:$0xff]  ;;  %v323_v24 = vld [vmem:[%s1171_s5 + $0x10] sm:$0xff]  ;;  %s974_s12 = smov 120   ;;  %s976_s8 = smov 104   ;;  %vm402_vm12 = vcmask 64512  }
  0x23   :  { %v248_v13 = vld [vmem:[%s1172_s6] sm:$0xff]  ;;  %v322_v26 = vld [vmem:[%s1171_s5 + $0x8] sm:$0xff]  ;;  %v320_v45 = vld [vmem:[#allocation11] sm:$0xff]  ;;  %s977_s26 = smov 112   ;;  %s978_s27 = smov 80   ;;  %vm623_vm14 = vcmask 195584  }
  0x24   :  { %174 = vmatpush.bf16.msra.mxu0 %v713_v3  ;;  %202 = vmatpush.msra.mxu1 %v182_v6  ;;  %v321_v27 = vld [vmem:[%s1171_s5] sm:$0xff]  ;;  %s973_s5 = smov 32   ;;  %v319_v47 = vld [vmem:[#allocation10] sm:$0xff]  ;;  %s979_s28 = smov 72  }
  0x25   :  { %269 = vmatpush.msrb.mxu3 %v249_v12  ;;  %v285_v28 = vld [vmem:[%s1173_s7] sm:$0x3]  ;;  %v354_v41 = vld [vmem:[#allocation8 + $0x8] sm:$0xff]  ;;  %s980_s29 = smov 16   ;;  %s981_s30 = smov 24  }
  0x26   :  { %203 = vmatpush.msra.mxu1 %v181_v7  ;;  %692 = vmatpush.msk.msra.mxu2 %vm290_vm7, %v285_v28  ;;  %v353_v42 = vld [vmem:[#allocation8] sm:$0xff] }
  0x27   :  { %687 = vmatmul.msk.bf16.vlgmr.msra.gmra.mxu0 %vm163_vm0, %v146_v5  ;;  %270 = vmatpush.msrb.mxu3 %v248_v13  ;;  %v351_v48 = vld [vmem:[%s1177_s11] sm:$0xff]  ;;  %s975_s11 = smov 88   ;;  %v391_v5 = vlaneseq }
  0x28   :  { %374 = vmatpush.msrb.mxu1 %v354_v41  ;;  %v352_v54 = vld [vmem:[#allocation13] sm:$0xff] }
  0x29   :  { %v392_v6 = vshrl.u32 %v391_v5, 7  ;;  %v394_v7 = vand.u32 127, %v391_v5 }
  0x2a   :  { %375 = vmatpush.msrb.mxu1 %v353_v42 }
  0x2b   :  { %vm395_vm13 = vcmp.ge.s32.totalorder %v392_v6, %v394_v7 }
  0xa4   :  { %v1094_v8 = vpop.f32.mrf.mxu0 }
  0xa5   :  { %v180_v9 = vmul.f32 %v1094_v8, %v1094_v8 }
  0xa7   :  { %250 = vrot.lane.b32.xlu0 %v180_v9, %s972_s1  ;;  %688 = vmatmul.msk.f32.vlgmr.msra.gmra.mxu1 %vm163_vm0, %v180_v9 }
  0xac   :  { %v178_v10 = vpop.f32.mrf.mxu0 }
 0x119   :  { %v251_v25 = vpop.permute.xlu0 %250 }
 0x124   :  { %v205_v14 = vpop.f32.mrf.mxu1 }
 0x125   :  { %v206_v15 = vadd.f32 1e-06, %v205_v14 }
 0x127   :  { %739 = vrsqrt.f32 %v206_v15  ;;  %vm214_vm3 = vweird.f32 %v206_v15 }
 0x12d   :  { %v740_v16 = vpop.eup %739 }
 0x12e   :  { %v209_v17 = vmul.f32 %v740_v16, %v206_v15  ;;  %vm215_vm2 = vweird.f32 %v740_v16 }
 0x12f   :  { %vm216_vm5 = vmor %vm214_vm3, %vm215_vm2 }
 0x130   :  { %v210_v18 = vmul.f32 %v740_v16, %v209_v17 }
 0x132   :  { %v211_v19 = vmul.f32 0.5, %v210_v18 }
 0x134   :  { %v212_v20 = vsub.f32 1.5, %v211_v19 }
 0x136   :  { %v213_v21 = vmul.f32 %v740_v16, %v212_v20 }
 0x138   :  { %v217_v23 = vsel %vm216_vm5, %v740_v16, %v213_v21 }
 0x139   :  { %690 = vmatmul.msk.f32.vlgmr.msra.gmra.mxu3 %vm219_vm4, %v217_v23 }
 0x13a   :  { %340 = vmatpush.msra.mxu3 %v324_v22 }
 0x13c   :  { %341 = vmatpush.msra.mxu3 %v323_v24 }
 0x13e   :  { %342 = vmatpush.msra.mxu3 %v322_v26 }
 0x140   :  { %343 = vmatpush.msra.mxu3 %v321_v27 }
 0x141   :  { %691 = vmatmul.msk.f32.vlgmr.msrb.gmra.mxu3 %vm252_vm6, %v251_v25  ;;  %v398_v25 = vpack.c.bf16 %v1094_v8, %v1094_v8 }
 0x1bc   :  { %v244_v29 = vpop.f32.mrf.mxu3 }
 0x1bd   :  { %v247_v30 = vmul.f32 %v244_v29, %v1094_v8 }
 0x1bf   :  { %694 = vmatmul.msk.f32.vlgmr.msra.gmra.mxu3 %vm163_vm0, %v247_v30  ;;  %v348_v50 = vmul.f32 %v319_v47, %v247_v30 }
 0x1c4   :  { %v272_v31 = vpop.f32.mrf.mxu3 }
 0x1c5   :  { %v273_v32 = vadd.f32 1e-06, %v272_v31 }
 0x1c7   :  { %741 = vrsqrt.f32 %v273_v32  ;;  %vm281_vm9 = vweird.f32 %v273_v32 }
 0x1cd   :  { %v742_v33 = vpop.eup %741 }
 0x1ce   :  { %v276_v34 = vmul.f32 %v742_v33, %v273_v32  ;;  %vm282_vm8 = vweird.f32 %v742_v33 }
 0x1cf   :  { %vm283_vm11 = vmor %vm281_vm9, %vm282_vm8 }
 0x1d0   :  { %v277_v35 = vmul.f32 %v742_v33, %v276_v34 }
 0x1d2   :  { %v278_v36 = vmul.f32 0.5, %v277_v35 }
 0x1d4   :  { %v279_v37 = vsub.f32 1.5, %v278_v36 }
 0x1d6   :  { %v280_v38 = vmul.f32 %v742_v33, %v279_v37 }
 0x1d8   :  { %v284_v39 = vsel %vm283_vm11, %v742_v33, %v280_v38 }
 0x1d9   :  { %693 = vmatmul.msk.f32.vlgmr.msra.gmra.mxu2 %vm286_vm10, %v284_v39 }
 0x242   :  { %v345_v46 = vpop.f32.mrf.mxu3 }
 0x243   :  { %v349_v49 = vmul.f32 %v345_v46, %v320_v45 }
 0x245   :  { %v350_v51 = vadd.f32 %v349_v49, %v348_v50 }
 0x247   :  { %v396_v52 = vpack.c.bf16 %v350_v51, %v350_v51 }
 0x25c   :  { %v311_v40 = vpop.f32.mrf.mxu2 }
 0x25d   :  { %315 = vrot.lane.b32.xlu0 %v311_v40, %s973_s5 }
 0x2cf   :  { %v316_v43 = vpop.permute.xlu0 %315 }
 0x2d0   :  { %v318_v44 = vmul.f32 %v316_v43, %v1094_v8 }
 0x2d2   :  { %356 = vrot.lane.b32.xlu1 %v318_v44, %s972_s1 }
 0x2da   :  { %381 = vrot.lane.b32.xlu1 %v351_v48, %s973_s5 }
 0x2e2   :  { %458 = vrot.lane.b32.xlu1 %v396_v52, %s974_s12 }
 0x344   :  { %v357_v53 = vpop.permute.xlu1 %356 }
 0x345   :  { %695 = vmatmul.msk.f32.vlgmr.msrb.gmra.mxu1 %vm252_vm6, %v357_v53 }
 0x34c   :  { %v382_v57 = vpop.permute.xlu1 %381 }
 0x34d   :  { %v384_v58 = vmul.f32 %v382_v57, %v318_v44 }
 0x354   :  { %v459_v0 = vpop.permute.xlu1 %458 }
 0x3c2   :  { %v377_v55 = vpop.f32.mrf.mxu1 }
 0x3c3   :  { %v385_v56 = vmul.f32 %v377_v55, %v352_v54 }
 0x3c5   :  { %387 = vrot.lane.b32.xlu2 %v385_v56, %s973_s5 }
 0x41f   :  { %v388_v59 = vpop.permute.xlu2 %387 }
 0x420   :  { %v390_v60 = vadd.f32 %v388_v59, %v384_v58 }
 0x422   :  { %v397_v61 = vpack.c.bf16 %v390_v60, %v390_v60 }
 0x424   :  { %507 = vrot.lane.b32.xlu0 %v397_v61, %s975_s11  ;;  %400 = vrot.lane.b32.xlu2 %v397_v61, %s972_s1  ;;  %s666_s1 = sshll.u32 %s1179_s13, 4  ;;  %s667_s1 = int_to_ptr.hbm [resolvable:$true] %s666_s1 }
 0x42c   :  { %562 = vrot.lane.b32.xlu0 %v396_v52, %s976_s8  ;;  %505 = vrot.lane.b32.xlu2 %v396_v52, %s977_s26 }
 0x47e   :  { %v401_v62 = vpop.permute.xlu2 %400 }
 0x47f   :  { %v407_v63 = vsel %vm402_vm12, %v401_v62, 0 }
 0x480   :  { %416 = vmatpush.bf16.xpose.msrb.mxu2 %v407_v63  ;;  %470 = vmatpush.bf16.xpose.msrb.mxu0 %v407_v63 }
 0x486   :  { %v506_v3 = vpop.permute.xlu2 %505 }
 0x487   :  { %696 = vmatmul.msk.bf16.vlgmr.msrb.gmra.mxu2 %vm402_vm12, %v396_v52  ;;  %698 = vmatmul.msk.bf16.vlgmr.msrb.gmra.mxu0 %vm402_vm12, %v459_v0 }
 0x496   :  { %v508_v1 = vpop.permute.xlu0 %507 }
 0x497   :  { %v513_v2 = vsel %vm402_vm12, %v508_v1, 0 }
 0x498   :  { %522 = vmatpush.bf16.xpose.msra.mxu2 %v513_v2  ;;  %574 = vmatpush.bf16.xpose.msra.mxu0 %v513_v2 }
 0x49e   :  { %v563_v4 = vpop.permute.xlu0 %562 }
 0x49f   :  { %700 = vmatmul.msk.bf16.vlgmr.msra.gmra.mxu2 %vm402_vm12, %v506_v3  ;;  %702 = vmatmul.msk.bf16.vlgmr.msra.gmra.mxu0 %vm402_vm12, %v563_v4 }
 0x504   :  { %v472_v9 = vpop.f32.mrf.mxu0 }
 0x505   :  { %v476_v10 = vsel %vm395_vm13, %v472_v9, -1e+30 }
 0x506   :  { %v477_v11 = vsel %vm402_vm12, %v476_v10, -inf }
 0x507   :  { %478 = vmax.xlane.f32.xlu2 %v477_v11  ;;  %v715_v11 = vld [vmem:[#allocation5] sm:$0xff] }
 0x50a   :  { %v418_v12 = vpop.f32.mrf.mxu2 }
 0x50b   :  { %v422_v13 = vsel %vm395_vm13, %v418_v12, -1e+30 }
 0x50c   :  { %v474_v14 = vpop.f32.mrf.mxu0  ;;  %v423_v15 = vsel %vm402_vm12, %v422_v13, -inf }
 0x50d   :  { %424 = vmax.xlane.f32.xlu1 %v423_v15 }
 0x512   :  { %v420_v16 = vpop.f32.mrf.mxu2 }
 0x51c   :  { %v576_v17 = vpop.f32.mrf.mxu0 }
 0x51d   :  { %v580_v18 = vsel %vm395_vm13, %v576_v17, -1e+30 }
 0x51e   :  { %v581_v19 = vsel %vm402_vm12, %v580_v18, -inf }
 0x51f   :  { %582 = vmax.xlane.f32.xlu2 %v581_v19 }
 0x522   :  { %v524_v20 = vpop.f32.mrf.mxu2 }
 0x523   :  { %v528_v21 = vsel %vm395_vm13, %v524_v20, -1e+30 }
 0x524   :  { %v578_v22 = vpop.f32.mrf.mxu0  ;;  %v529_v23 = vsel %vm402_vm12, %v528_v21, -inf }
 0x525   :  { %530 = vmax.xlane.f32.xlu0 %v529_v23 }
 0x52a   :  { %v526_v24 = vpop.f32.mrf.mxu2 }
 0x539   :  { %436 = vrot.lane.b32.xlu0 %v398_v25, %s978_s27 }
 0x57a   :  { %v479_v26 = vpop.xlane.xlu2 %478 }
 0x57b   :  { %v480_v27 = vsub.f32 %v476_v10, %v479_v26  ;;  %v716_v10 = vld [vmem:[#allocation5 + $0x8] sm:$0xff] }
 0x57c   :  { %651 = vmatpush.bf16.msrb.mxu2 %v716_v10 }
 0x57d   :  { %v481_v28 = vmul.f32 1.442695, %v480_v27 }
 0x57f   :  { %743 = vpow2.f32 %v481_v28 }
 0x580   :  { %v425_v29 = vpop.xlane.xlu1 %424  ;;  %652 = vmatpush.bf16.msrb.mxu2 %v715_v11 }
 0x581   :  { %v426_v30 = vsub.f32 %v422_v13, %v425_v29 }
 0x583   :  { %v427_v31 = vmul.f32 1.442695, %v426_v30 }
 0x585   :  { %v744_v32 = vpop.eup %743  ;;  %745 = vpow2.f32 %v427_v31 }
 0x586   :  { %v483_v33 = vsel %vm402_vm12, %v744_v32, 0.0 }
 0x587   :  { %484 = vadd.xlane.f32.xlu2 %v483_v33 }
 0x58b   :  { %v746_v34 = vpop.eup %745 }
 0x58c   :  { %v429_v35 = vsel %vm402_vm12, %v746_v34, 0.0 }
 0x58d   :  { %430 = vadd.xlane.f32.xlu1 %v429_v35 }
 0x592   :  { %v583_v36 = vpop.xlane.xlu2 %582 }
 0x593   :  { %v584_v8 = vsub.f32 %v580_v18, %v583_v36 }
 0x595   :  { %v585_v37 = vmul.f32 1.442695, %v584_v8 }
 0x597   :  { %747 = vpow2.f32 %v585_v37 }
 0x598   :  { %v531_v38 = vpop.xlane.xlu0 %530 }
 0x599   :  { %v532_v39 = vsub.f32 %v528_v21, %v531_v38 }
 0x59b   :  { %v533_v40 = vmul.f32 1.442695, %v532_v39 }
 0x59d   :  { %v748_v41 = vpop.eup %747  ;;  %749 = vpow2.f32 %v533_v40 }
 0x59e   :  { %v587_v42 = vsel %vm402_vm12, %v748_v41, 0.0 }
 0x59f   :  { %588 = vadd.xlane.f32.xlu2 %v587_v42 }
 0x5a3   :  { %v750_v43 = vpop.eup %749 }
 0x5a4   :  { %v535_v44 = vsel %vm402_vm12, %v750_v43, 0.0 }
 0x5a5   :  { %536 = vadd.xlane.f32.xlu1 %v535_v44 }
 0x5ab   :  { %v437_v45 = vpop.permute.xlu0 %436 }
 0x5ac   :  { %v442_v46 = vsel %vm223_vm1, %v437_v45, 0 }
 0x5ad   :  { %451 = vmatpush.bf16.msrb.mxu3 %v442_v46  ;;  %499 = vmatpush.bf16.msra.mxu1 %v442_v46 }
 0x5be   :  { %541 = vrot.lane.b32.xlu1 %v398_v25, %s979_s28 }
 0x5fa   :  { %v485_v47 = vpop.xlane.xlu2 %484 }
 0x5fb   :  { %751 = vrcp.f32 %v485_v47 }
 0x600   :  { %v431_v48 = vpop.xlane.xlu1 %430 }
 0x601   :  { %v752_v49 = vpop.eup %751  ;;  %753 = vrcp.f32 %v431_v48 }
 0x602   :  { %v487_v50 = vmul.f32 %v752_v49, %v744_v32 }
 0x604   :  { %v488_v51 = vpack.c.bf16 %v487_v50, %v487_v50 }
 0x606   :  { %699 = vmatmul.msk.bf16.vlgmr.msra.gmra.mxu1 %vm402_vm12, %v488_v51 }
 0x607   :  { %v754_v52 = vpop.eup %753 }
 0x608   :  { %v433_v53 = vmul.f32 %v754_v52, %v746_v34 }
 0x60a   :  { %v434_v54 = vpack.c.bf16 %v433_v53, %v433_v53 }
 0x60c   :  { %697 = vmatmul.msk.bf16.vlgmr.msrb.gmra.mxu3 %vm402_vm12, %v434_v54 }
 0x612   :  { %v589_v55 = vpop.xlane.xlu2 %588 }
 0x613   :  { %755 = vrcp.f32 %v589_v55 }
 0x618   :  { %v537_v56 = vpop.xlane.xlu1 %536 }
 0x619   :  { %757 = vrcp.f32 %v537_v56  ;;  %v756_v57 = vpop.eup %755 }
 0x61a   :  { %v591_v59 = vmul.f32 %v756_v57, %v748_v41 }
 0x61c   :  { %v592_v63 = vpack.c.bf16 %v591_v59, %v591_v59 }
 0x61f   :  { %v758_v58 = vpop.eup %757 }
 0x620   :  { %v539_v60 = vmul.f32 %v758_v58, %v750_v43 }
 0x622   :  { %v540_v0 = vpack.c.bf16 %v539_v60, %v539_v60 }
 0x630   :  { %v542_v61 = vpop.permute.xlu1 %541 }
 0x631   :  { %v547_v62 = vsel %vm223_vm1, %v542_v61, 0 }
 0x632   :  { %556 = vmatpush.bf16.msra.mxu3 %v547_v62  ;;  %603 = vmatpush.bf16.msrb.mxu1 %v547_v62 }
 0x635   :  { %701 = vmatmul.msk.bf16.vlgmr.msra.gmra.mxu3 %vm402_vm12, %v540_v0  ;;  %703 = vmatmul.msk.bf16.vlgmr.msrb.gmra.mxu1 %vm402_vm12, %v592_v63 }
 0x683   :  { %v501_v1 = vpop.f32.mrf.mxu1 }
 0x684   :  { %610 = vrot.lane.b32.xlu2 %v501_v1, %s966_s21  ;;  %s982_s21 = smov [#allocation14]  }
 0x685   :  { %s664_s14 = sshll.u32 %s982_s21, 4  ;;  %s665_s14 = int_to_ptr.vmem [resolvable:$true] %s664_s14 }
 0x68b   :  { %v503_v2 = vpop.f32.mrf.mxu1 }
 0x68f   :  { %v453_v3 = vpop.f32.mrf.mxu3 }
 0x697   :  { %v455_v4 = vpop.f32.mrf.mxu3 }
 0x6b2   :  { %v605_v5 = vpop.f32.mrf.mxu1 }
 0x6b8   :  { %v558_v6 = vpop.f32.mrf.mxu3 }
 0x6b9   :  { %614 = vrot.lane.b32.xlu0 %v558_v6, %s980_s29 }
 0x6ba   :  { %v607_v7 = vpop.f32.mrf.mxu1 }
 0x6c0   :  { %v560_v9 = vpop.f32.mrf.mxu3 }
 0x6c1   :  { %618 = vrot.lane.b32.xlu0 %v605_v5, %s981_s30 }
 0x6de   :  { %v611_v13 = vpop.permute.xlu2 %610 }
 0x6df   :  { %v621_v14 = vsel %vm402_vm12, %v453_v3, %v611_v13 }
 0x72b   :  { %v615_v12 = vpop.permute.xlu0 %614 }
 0x72c   :  { %v622_v15 = vsel %vm252_vm6, %v621_v14, %v615_v12 }
 0x733   :  { %v619_v16 = vpop.permute.xlu0 %618 }
 0x734   :  { %v624_v17 = vsel %vm623_vm14, %v622_v15, %v619_v16 }
 0x735   :  { %v625_v18 = vpack.c.bf16 %v624_v17, %v624_v17 }
 0x737   :  { %712 = vmatmul.msk.bf16.vlgmr.msrb.gmra.mxu2 %vm163_vm0, %v625_v18 }
 0x7ba   :  { %v654_v19 = vpop.f32.mrf.mxu2 }
 0x7bb   :  { %658 = vst.msk [vmem:[#allocation14] sm:$0xff] %vm163_vm0, %v654_v19 }
 0x7bc   :  { %669 = dma.vmem_to_hbm [thread:$0]  %s665_s14, 128, %s667_s1, [#allocation4]  }
 0x7c2   :  { %v656_v20 = vpop.f32.mrf.mxu2 }
 0x7c3   :  { %959 = dma.done.wait [#allocation4], 128  }
 0x7c4   :  { %960 = vsyncadd [#allocation4], 4294967168 }
 0x7c5   :  { %674 = vsyncpa [#allocation3], 1 }
 0x7c6   :  { %675 = vsyncpa [#allocation6], 1 }
 0x7c7   :  { %676 = vsyncpa [#allocation9], 1 }
 0x7c8   :  { %677 = vsyncpa [#allocation12], 1 }
 0x7c9   :  { %678 = vsyncpa [#allocation4], 1 }

</bundles_post_ra>
